<compile_context>
chip_gen: v7x
topology: tpu7x:2x2x1
jax: 0.10.0
libtpu: 0.0.40
codegen_flags: <defaults>
</compile_context>

<pallas_src>
import functools

import jax
import jax.numpy as jnp
from jax.experimental import pallas as pl
from jax.experimental.pallas import tpu as pltpu

_BN_EPS = 1e-5


# ---------------------------------------------------------------------------
# Pass 1: per-tile  h = x @ w1  (MXU), stash h to HBM, emit partial BN stats.
# ---------------------------------------------------------------------------
def _matmul_stats_kernel(x_ref, w1_ref, h_ref, stats_ref, *, matmul_dtype):
    # Linear(in_features -> fc0); bias omitted (cancels under training-mode BN).
    x = x_ref[...].astype(matmul_dtype)          # w1 is pre-cast in the wrapper
    h = jnp.dot(x, w1_ref[...], preferred_element_type=jnp.float32)  # [t, fc0] f32
    h_ref[...] = h.astype(h_ref.dtype)
    # Per-tile partial statistics in f32 (combined on the host side -> no
    # cross-tile accumulator, so this grid axis stays "parallel").
    s = jnp.sum(h, axis=0, keepdims=True)        # [1, fc0]
    ss = jnp.sum(h * h, axis=0, keepdims=True)   # [1, fc0]
    stats_ref[...] = jnp.concatenate([s, ss], axis=0).reshape(stats_ref.shape)


# ---------------------------------------------------------------------------
# Pass 2: per-tile  BN scale/shift + ReLU + (fc0 -> 1) contraction + tanh.
# ---------------------------------------------------------------------------
def _bn_relu_head_kernel(h_ref, ss_ref, w2_ref, b2_ref, o_ref):
    h = h_ref[...].astype(jnp.float32)           # [t, fc0]
    ss = ss_ref[...]                             # [2, fc0]: row0=scale, row1=shift
    y = jnp.maximum(h * ss[0:1, :] + ss[1:2, :], 0.0)
    # fc0 -> 1 Linear as a lane-dense (1, t) contraction on the (idle) MXU.
    out = jax.lax.dot_general(
        w2_ref[...], y,
        dimension_numbers=(((1,), (1,)), ((), ())),
        preferred_element_type=jnp.float32)      # [1, t], lane-major
    out = jnp.tanh(out + b2_ref[0])              # b2 is a scalar in SMEM
    o_ref[...] = out.reshape(o_ref.shape)        # lane-dense (1, 1, t) store


# ---------------------------------------------------------------------------
# Host-side helpers.
# ---------------------------------------------------------------------------
def _vmem_capacity_bytes():
    try:
        return int(pltpu.get_tpu_info().vmem_capacity_bytes)
    except Exception:  # CPU tracing / older runtimes: assume v7x's 64 MiB.
        return 64 * 1024 * 1024


def _pick_batch_tile(batch, in_features, fc0, x_itemsize, h_itemsize, budget):
    """Largest tile dividing batch whose pass-1 working set fits the budget."""
    for t in (1024, 512, 256, 128, 64, 32, 16, 8):
        if batch % t:
            continue
        est = (2 * t * in_features * x_itemsize      # double-buffered x tiles
               + 2 * in_features * fc0 * h_itemsize  # w1 (conservatively x2)
               + 2 * t * fc0 * h_itemsize            # double-buffered h tiles
               + 4 * t * fc0 * 4                     # f32 temporaries
               + (1 << 16))
        if est <= budget:
            return t
    return batch  # tiny / odd batch: single tile


def value_head_flat(x, w1, b1, gamma, beta, w2, b2,
                    *, batch_tile=None, matmul_dtype=jnp.bfloat16):
    """Full _ValueHeadFlat forward as two pipelined Pallas calls.

    x:  [batch, in_features]   (float32 or bfloat16)
    w1: [in_features, fc0]     (transposed vs torch), b1: [fc0] (cancelled, see below)
    gamma/beta: [fc0] BatchNorm1d affine;  w2: [fc0, 1];  b2: [1]
    """
    # b1 cancels exactly under training-mode BatchNorm (mean subtraction); it is
    # accepted for API fidelity but never shipped to the kernels.
    del b1

    matmul_dtype = jnp.dtype(matmul_dtype)
    batch, in_features = x.shape
    fc0 = w1.shape[1]

    x_isz = jnp.dtype(x.dtype).itemsize
    h_isz = matmul_dtype.itemsize

    cap = _vmem_capacity_bytes()
    budget = (3 * cap) // 4
    if batch_tile is None:
        batch_tile = _pick_batch_tile(batch, in_features, fc0, x_isz, h_isz, budget)
    assert batch % batch_tile == 0
    num_tiles = batch // batch_tile

    def _limit(est):
        return int(min(budget, max(32 * 1024 * 1024, 2 * est)))

    # One-time weight cast, hoisted out of the kernel body.
    w1_c = w1.astype(matmul_dtype)

    # ------------------------------ pass 1 ---------------------------------
    est1 = (2 * batch_tile * in_features * x_isz
            + 2 * in_features * fc0 * h_isz
            + 2 * batch_tile * fc0 * h_isz
            + 4 * batch_tile * fc0 * 4 + 2 * 2 * fc0 * 4)
    h, stats = pl.pallas_call(
        functools.partial(_matmul_stats_kernel, matmul_dtype=matmul_dtype),
        out_shape=(jax.ShapeDtypeStruct((batch, fc0), matmul_dtype),
                   jax.ShapeDtypeStruct((num_tiles, 2, fc0), jnp.float32)),
        grid_spec=pltpu.PrefetchScalarGridSpec(
            num_scalar_prefetch=0,
            grid=(num_tiles,),
            in_specs=[
                pl.BlockSpec((batch_tile, in_features), lambda i: (i, 0)),  # x tile
                pl.BlockSpec((in_features, fc0), lambda i: (0, 0)),         # w1
            ],
            out_specs=(
                pl.BlockSpec((batch_tile, fc0), lambda i: (i, 0)),          # h tile
                pl.BlockSpec((1, 2, fc0), lambda i: (i, 0, 0)),             # partial stats
            ),
        ),
        compiler_params=pltpu.CompilerParams(
            dimension_semantics=("parallel",),
            vmem_limit_bytes=_limit(est1)),
        cost_estimate=pl.CostEstimate(
            flops=2 * batch * in_features * fc0 + 3 * batch * fc0,
            transcendentals=0,
            bytes_accessed=(batch * in_features * x_isz
                            + in_features * fc0 * h_isz
                            + batch * fc0 * h_isz
                            + num_tiles * 2 * fc0 * 4)),
    )(x, w1_c)

    # ----------------- tiny jnp glue: combine stats, fold BN ---------------
    sums = jnp.sum(stats, axis=0)                       # [2, fc0] f32
    inv_b = jnp.float32(1.0 / batch)
    mean = sums[0] * inv_b
    # Single-pass E[h^2]-E[h]^2 variance in f32 (clamped); matches the
    # training-mode BatchNorm batch statistics.
    var = jnp.maximum(sums[1] * inv_b - mean * mean, 0.0)
    scale = gamma.astype(jnp.float32) * jax.lax.rsqrt(var + _BN_EPS)
    shift = beta.astype(jnp.float32) - mean * scale
    scale_shift = jnp.stack([scale, shift], axis=0)     # [2, fc0] f32

    w2_row = w2.reshape(1, fc0).astype(jnp.float32)
    b2_s = b2.reshape(1).astype(jnp.float32)

    # ------------------------------ pass 2 ---------------------------------
    est2 = (2 * batch_tile * fc0 * h_isz
            + 4 * batch_tile * fc0 * 4
            + 2 * batch_tile * 4 + 6 * fc0 * 4)
    out3 = pl.pallas_call(
        _bn_relu_head_kernel,
        out_shape=jax.ShapeDtypeStruct((num_tiles, 1, batch_tile), jnp.float32),
        grid_spec=pltpu.PrefetchScalarGridSpec(
            num_scalar_prefetch=0,
            grid=(num_tiles,),
            in_specs=[
                pl.BlockSpec((batch_tile, fc0), lambda i: (i, 0)),    # h tile
                pl.BlockSpec((2, fc0), lambda i: (0, 0)),             # scale/shift
                pl.BlockSpec((1, fc0), lambda i: (0, 0)),             # w2 row
                pl.BlockSpec(memory_space=pltpu.MemorySpace.SMEM),    # b2 scalar
            ],
            out_specs=pl.BlockSpec((1, 1, batch_tile), lambda i: (i, 0, 0)),
        ),
        compiler_params=pltpu.CompilerParams(
            dimension_semantics=("parallel",),
            vmem_limit_bytes=_limit(est2)),
        cost_estimate=pl.CostEstimate(
            flops=5 * batch * fc0,
            transcendentals=batch,
            bytes_accessed=batch * fc0 * h_isz + batch * 4 + 3 * fc0 * 4),
    )(h, scale_shift, w2_row, b2_s)

    return out3.reshape(batch, 1)


# ---------------------------------------------------------------------------
# Reference + self-test.
# ---------------------------------------------------------------------------
def _reference(x, w1, b1, gamma, beta, w2, b2):
    h = x @ w1 + b1
    mean = jnp.mean(h, axis=0, keepdims=True)
    var = jnp.mean(jnp.square(h - mean), axis=0, keepdims=True)
    h = (h - mean) / jnp.sqrt(var + _BN_EPS)
    h = h * gamma.reshape(1, -1) + beta.reshape(1, -1)
    h = jnp.maximum(h, 0.0)
    return jnp.tanh(h @ w2 + b2.reshape(1, 1))


if __name__ == "__main__":
    # Small shapes consistent with the module (defaults are 512 / 256).
    batch, in_features, fc0 = 32, 64, 32

    key = jax.random.PRNGKey(0)
    kx, kw1, kb1, kg, kb, kw2, kb2 = jax.random.split(key, 7)

    x = jax.random.normal(kx, (batch, in_features), jnp.float32)
    w1 = jax.random.normal(kw1, (in_features, fc0), jnp.float32) / jnp.sqrt(in_features)
    b1 = jax.random.normal(kb1, (fc0,), jnp.float32) / jnp.sqrt(in_features)
    gamma = 1.0 + 0.1 * jax.random.normal(kg, (fc0,), jnp.float32)
    beta = 0.1 * jax.random.normal(kb, (fc0,), jnp.float32)
    w2 = jax.random.normal(kw2, (fc0, 1), jnp.float32) / jnp.sqrt(fc0)
    b2 = jax.random.normal(kb2, (1,), jnp.float32) / jnp.sqrt(fc0)

    ref = _reference(x, w1, b1, gamma, beta, w2, b2)

    # f32 MXU path; batch_tile=8 forces a 4-step grid so the tiled partial-stat
    # path and the second (epilogue) pass see multiple tiles.
    out = value_head_flat(x, w1, b1, gamma, beta, w2, b2,
                          batch_tile=8, matmul_dtype=jnp.float32)
    out = jax.block_until_ready(out)
    assert out.shape == (batch, 1)
    assert jnp.allclose(out, ref, atol=2e-5, rtol=2e-5), (out, ref)

    # bf16 MXU fast path (default on all generations incl. v5e); auto tile.
    out_bf16 = value_head_flat(x, w1, b1, gamma, beta, w2, b2,
                               matmul_dtype=jnp.bfloat16)
    out_bf16 = jax.block_until_ready(out_bf16)
    assert out_bf16.shape == (batch, 1)
    assert jnp.allclose(out_bf16, ref, atol=5e-2, rtol=5e-2), (out_bf16, ref)

    print("KERNEL_OK")
</pallas_src>

<mosaic_0001>
module attributes {stable_mosaic.version = 11 : i64} {
  func.func @_matmul_stats_kernel(%arg0: i32, %arg1: memref<8x64xf32, #tpu.memory_space<vmem>>, %arg2: memref<64x32xf32, #tpu.memory_space<vmem>>, %arg3: memref<8x32xf32, #tpu.memory_space<vmem>>, %arg4: memref<1x2x32xf32, #tpu.memory_space<vmem>>) attributes {dimension_semantics = [#tpu.dimension_semantics<parallel>], iteration_bounds = array<i64: 4>, scalar_prefetch = 0 : i64, scratch_operands = 0 : i64, tpu.core_type = #tpu.core_type<tc>, window_params = [{transform_indices = @transform_0, window_bounds = array<i64: 8, 64>}, {pipeline_mode = #tpu.pipeline_mode<synchronous>, transform_indices = @transform_1, window_bounds = array<i64: 64, 32>}, {transform_indices = @transform_2, window_bounds = array<i64: 8, 32>}, {transform_indices = @transform_3, window_bounds = array<i64: 1, 2, 32>}]} {
    %c0 = arith.constant 0 : index
    %c0_0 = arith.constant 0 : index
    %0 = vector.load %arg1[%c0, %c0_0] : memref<8x64xf32, #tpu.memory_space<vmem>>, vector<8x64xf32>
    %c0_1 = arith.constant 0 : index
    %c0_2 = arith.constant 0 : index
    %1 = vector.load %arg2[%c0_1, %c0_2] : memref<64x32xf32, #tpu.memory_space<vmem>>, vector<64x32xf32>
    %cst = arith.constant dense<0.000000e+00> : vector<8x32xf32>
    %2 = tpu.matmul %0, %1, %cst {dimension_numbers = #tpu.dot_dimension_numbers<[1], [0], [0], [1], [0, 0, 1, 1], [], []>} : vector<8x64xf32>, vector<64x32xf32>, vector<8x32xf32> -> vector<8x32xf32>
    %c0_3 = arith.constant 0 : index
    %c0_4 = arith.constant 0 : index
    %3 = vector.load %arg3[%c0_3, %c0_4] : memref<8x32xf32, #tpu.memory_space<vmem>>, vector<8x32xf32>
    tpu.vector_store %arg3[%c0_3, %c0_4], %2 {strides = array<i32>} : memref<8x32xf32, #tpu.memory_space<vmem>>, vector<8x32xf32>,
    %cst_5 = arith.constant dense<0.000000e+00> : vector<32xf32>
    %4 = vector.multi_reduction <add>, %2, %cst_5 [0] : vector<8x32xf32> to vector<32xf32>
    %5 = vector.shape_cast %4 : vector<32xf32> to vector<1x32xf32>
    %6 = arith.mulf %2, %2 : vector<8x32xf32>
    %cst_6 = arith.constant dense<0.000000e+00> : vector<32xf32>
    %7 = vector.multi_reduction <add>, %6, %cst_6 [0] : vector<8x32xf32> to vector<32xf32>
    %8 = vector.shape_cast %7 : vector<32xf32> to vector<1x32xf32>
    %9 = tpu.concatenate %5, %8 in 0 : vector<1x32xf32>, vector<1x32xf32> -> vector<2x32xf32>
    %10 = vector.shape_cast %9 : vector<2x32xf32> to vector<1x2x32xf32>
    %c0_7 = arith.constant 0 : index
    %c0_8 = arith.constant 0 : index
    %c0_9 = arith.constant 0 : index
    %11 = vector.load %arg4[%c0_7, %c0_8, %c0_9] : memref<1x2x32xf32, #tpu.memory_space<vmem>>, vector<1x2x32xf32>
    tpu.vector_store %arg4[%c0_7, %c0_8, %c0_9], %10 {strides = array<i32>} : memref<1x2x32xf32, #tpu.memory_space<vmem>>, vector<1x2x32xf32>,
    return
  }
  func.func @transform_0(%arg0: i32) -> (i32, i32) {
    %c0_i32 = arith.constant 0 : i32
    %c0_i32_0 = arith.constant 0 : i32
    return %arg0, %c0_i32 : i32, i32
  }
  func.func @transform_1(%arg0: i32) -> (i32, i32) {
    %c0_i32 = arith.constant 0 : i32
    %c0_i32_0 = arith.constant 0 : i32
    %c0_i32_1 = arith.constant 0 : i32
    return %c0_i32, %c0_i32_0 : i32, i32
  }
  func.func @transform_2(%arg0: i32) -> (i32, i32) {
    %c0_i32 = arith.constant 0 : i32
    %c0_i32_0 = arith.constant 0 : i32
    return %arg0, %c0_i32 : i32, i32
  }
  func.func @transform_3(%arg0: i32) -> (i32, i32, i32) {
    %c0_i32 = arith.constant 0 : i32
    %c0_i32_0 = arith.constant 0 : i32
    %c0_i32_1 = arith.constant 0 : i32
    return %arg0, %c0_i32, %c0_i32_0 : i32, i32, i32
  }
}

</mosaic_0001>

<bundles_post_ra>
// kernel: tpu_custom_call.1
= control target key start
LH: loop header
LB: loop body
LE: loop exit
PB: predicated region body
PF: predicated region fallthrough
CT: control target
= control target key end

     0   :  { %9 = vsyncpa [#allocation3], 0  ;;  %s788_s0 = inlined_call_operand.vmem [shape: f32[32,64], index: 0, kind: input, shape index: {}]   ;;  %s789_s1 = inlined_call_operand.vmem [shape: f32[64,32], index: 1, kind: input, shape index: {}]   ;;  %s790_s2 = inlined_call_operand.hbm [shape: f32[32,32], index: 2, kind: output, shape index: {0}]   ;;  %s791_s3 = inlined_call_operand.hbm [shape: f32[4,2,32], index: 3, kind: output, shape index: {1}]  }
   0x1   :  { %11 = vsyncpa [#allocation3 + $0x1], 0 }
   0x2   :  { %12 = vsyncpa [#allocation5], 0 }
   0x3   :  { %14 = vsyncpa [#allocation5 + $0x1], 0  ;;  %s626_s12 = smov 0   ;;  %s628_s13 = smov 0  }
   0x4   :  { %s630_s14 = smov 0   ;;  %s632_s15 = smov 0  }
   0x5 LB: > { %s647_s16 = sadd.s32 4294967295, %s599_s15   ;;  %s404_s17 = sadd.s32 4294967294, %s599_s15   ;;  %s599_s15 = sphi %s632_s15, %s797_s15   ;;  %s595_s14 = sphi %s630_s14, %s796_s14   ;;  %s591_s13 = sphi %s628_s13, %s795_s13   ;;  %s587_s12 = sphi %s626_s12, %s794_s12  }
   0x6   : > { %s651_s18 = sadd.s32 1, %s599_s15   ;;  %s74_s19 = sadd.s32 1, %s595_s14 }
   0x7   : > { %s71_s20 = ssub.s32 %s599_s15, %s651_s18  ;;  %p84_p0 = scmp.ne.s32.totalorder %s595_s14, %s591_s13 }
   0x8   : > { %p72_p1 = scmp.eq.s32.totalorder %s71_s20, 0  ;;  %p85_p2 = scmp.eq.s32.totalorder %s647_s16, 3 }
   0x9   : > { %p90_p3 = scmp.ne.s32.totalorder %s591_s13, %s587_s12  ;;  %p91_p4 = scmp.eq.s32.totalorder %s404_s17, 3 }
   0xa   : > { %s662_s21 = scalar_select %p72_p1, %s595_s14, %s74_s19  }
   0xb   : > { %p664_p5 = por %p85_p2, %p84_p0  ;;  %p668_p6 = por %p91_p4, %p90_p3 }
   0xc   : > { %p407_p7 = scmp.ge.s32.totalorder %s599_s15, 1  ;;  %p145_p8 = scmp.lt.s32.totalorder %s599_s15, 5 }
   0xe   : > { %p146_p9 = pnand %p407_p7, %p145_p8 }
   0xf   : > { %v178_v0 = vld [vmem:[%s789_s1] sm:$0xff] (!%p146_p9)  ;;  %v179_v1 = vld [vmem:[%s789_s1 + $0x8] sm:$0xff] (!%p146_p9)  ;;  %v180_v2 = vld [vmem:[%s789_s1 + $0x10] sm:$0xff] (!%p146_p9)  ;;  %v601_v3 = vmov (!%p146_p9), 0.0|0.0   ;;  %vm602_vm0 = vmmov (!%p146_p9), 0   ;;  %v603_v6 = vmov (!%p146_p9), 0.0  }
  0x10   : > { %149 = sbr.rel (%p146_p9) target bundleno = 287 (0x11f), region = 28  ;;  %446 = vmatprep.subr.bf16.mxu0 (!%p146_p9), %v601_v3  ;;  %v447_v4 = vpack.c.bf16 (!%p146_p9), %v179_v1, %v178_v0  ;;  %v181_v5 = vld [vmem:[%s789_s1 + $0x18] sm:$0xff] (!%p146_p9)  ;;  %443 = vmatprep.mubr.msk.f32.mxu0 (!%p146_p9), %vm602_vm0, %v603_v6  ;;  %p173_p10 = scmp.lt.s32.totalorder (!%p146_p9), %s647_s16, 3  ;;  %v182_v8 = vld [vmem:[%s789_s1 + $0x20] sm:$0xff] (!%p146_p9)  ;;  %v183_v9 = vld [vmem:[%s789_s1 + $0x28] sm:$0xff] (!%p146_p9)  ;;  %vm186_vm1 = vcmask (!%p146_p9), 523264  }
  0x11   : > { %v450_v7 = vpack.c.bf16 (!%p146_p9), %v181_v5, %v180_v2  ;;  %v453_v10 = vpack.c.bf16 (!%p146_p9), %v183_v9, %v182_v8  ;;  %v184_v11 = vld [vmem:[%s789_s1 + $0x30] sm:$0xff] (!%p146_p9)  ;;  %v185_v12 = vld [vmem:[%s789_s1 + $0x38] sm:$0xff] (!%p146_p9)  ;;  %s704_s27 = sand.u32 (!%p146_p9), 1, %s591_s13   ;;  %s414_s29 = sshll.u32 (!%p146_p9), %s647_s16, 7  ;;  %vm260_vm2 = vcmask (!%p146_p9), 261120  }
  0x12   : > { %448 = vmatpush3.bf16.msra.mxu0 (!%p146_p9), %v447_v4  ;;  %v456_v13 = vpack.c.bf16 (!%p146_p9), %v185_v12, %v184_v11  ;;  %s408_s28 = sshll.u32 (!%p146_p9), %s704_s27, 3  ;;  %s711_s7 = scalar_lea.hbm (!%p146_p9), %s790_s2, %s414_s29 }
  0x13   : > { %449 = vmatprep.subr.bf16.mxu0 (!%p146_p9), %v601_v3  ;;  %s165_s30 = scalar_lea.vmem (!%p146_p9), [#allocation2], %s408_s28  ;;  %s282_s8 = scalar_lea.sflag (!%p146_p9), [#allocation3], %s704_s27 }
  0x14   : > { %s300_s4 = sshll.u32 (!%p146_p9), %s165_s30, 4  ;;  %s604_s10 = smov (!%p146_p9), [#allocation2]   ;;  %s713_s4 = int_to_ptr.vmem [resolvable:$true] %s300_s4 }
  0x15   : > { %s509_s11 = sshll.u32 (!%p146_p9), %s604_s10, 4  ;;  %s510_s11 = int_to_ptr.vmem [resolvable:$false] %s509_s11 }
  0x16   : > { %451 = vmatpush3.bf16.msra.mxu0 (!%p146_p9), %v450_v7  ;;  %s511_s17 = scalar_lea.vmem (!%p146_p9), %s510_s11, 256  ;;  %p512_p0 = scmp.lt.s32.totalorder (!%p146_p9), %s713_s4, %s510_s11 }
  0x17   : > { %s174_s9 = scalar_select %p173_p10, %s647_s16, 3  ;;  %452 = vmatprep.subr.bf16.mxu0 %v601_v3 }
  0x19   : > { %s410_s20 = sshll.u32 %s174_s9, 3  ;;  %s505_s9 = scalar_lea.vmem %s713_s4, 128 }
  0x1a   : > { %454 = vmatpush3.bf16.msra.mxu0 %v453_v10  ;;  %s176_s26 = scalar_lea.vmem %s788_s0, %s410_s20  ;;  %p506_p11 = scmp.ne.s32.totalorder %s713_s4, %s505_s9 }
  0x1b   : > { %455 = vmatprep.subr.bf16.mxu0 %v601_v3  ;;  %v177_v14 = vld [vmem:[%s176_s26] sm:$0xff]  ;;  %p513_p1 = scmp.lt.s32.totalorder %s511_s17, %s505_s9 }
  0x1c   : > { %p507_p12 = pnand %p506_p11, %p664_p5 }
  0x1d   : > { %p514_p2 = por %p513_p1, %p512_p0 }
  0x1e   : > { %457 = vmatpush3.bf16.msra.mxu0 %v456_v13  ;;  %p508_p13 = pneg %p507_p12 }
  0x20   : > { %p515_p3 = pnand %p514_p2, %p508_p13 }
  0x21   : > { %444 = vmatmul.mubr.msk.f32.vlgmr.msra.gmra.mrb[0].mxu0 %vm186_vm1, %v177_v14 }
  0xf4   : > { %v256_v15 = vpop.f32.mrb[0].mxu0 }
  0xf5   : > { %v262_v16 = vsel %vm260_vm2, %v256_v15, 0.0  ;;  %v269_v17 = vmul.f32 %v256_v15, %v256_v15  ;;  %v445_v18 = vpop.f32.mrb[1].mxu0  ;;  %261 = vst.msk [vmem:[%s165_s30] sm:$0xff] %vm260_vm2, %v256_v15 }
  0xf6   : > { %v263_v19 = vrot.slane %v262_v16, 4 }
  0xf7   : > { %518 = shalt.err (!%p515_p3)
}
  0xf8   : > { %s519_s19 = scalar_lea.hbm %s711_s7, 128  ;;  %s523_s25 = scalar_lea.hbm %s790_s2, 512 }
  0xf9   : > { %p520_p4 = scmp.ne.s32.totalorder %s711_s7, %s519_s19  ;;  %p524_p9 = scmp.lt.u32.totalorder %s711_s7, %s790_s2 }
  0xfa   : > { %p525_p10 = scmp.lt.u32.totalorder %s523_s25, %s519_s19  ;;  %p527_p12 = scmp.lt.u32.totalorder %s519_s19, %s711_s7 }
  0xfb   : > { %p521_p7 = pnand %p520_p4, %p664_p5 }
  0xfc   : > { %p526_p11 = por %p525_p10, %p524_p9 }
  0xfd   : > { %p522_p8 = pneg %p521_p7 }
  0xfe   : > { %p528_p13 = por %p527_p12, %p526_p11 }
 0x100   : > { %p529_p0 = pnand %p528_p13, %p522_p8 }
 0x102   : > { %532 = shalt.err (!%p529_p0)
}
 0x103   : > { %458 = dma.vmem_to_hbm [thread:$0]  (%p664_p5), %s713_s4, 128, %s711_s7, %s282_s8   ;;  %v270_v20 = vsel %vm260_vm2, %v269_v17, 0.0  ;;  %v264_v21 = vadd.f32 %v263_v19, %v262_v16  ;;  %vm277_vm3 = vcmask 1040384   ;;  %vm279_vm4 = vcmask 254976  }
 0x104   : > { %v271_v22 = vrot.slane %v270_v20, 4  ;;  %s409_s29 = sshll.u32 %s704_s27, 1  ;;  %s415_s30 = sshll.u32 %s647_s16, 5 }
 0x105   : > { %v265_v23 = vrot.slane %v264_v21, 2  ;;  %s172_s5 = scalar_lea.vmem [#allocation4], %s409_s29  ;;  %s745_s8 = scalar_lea.hbm %s791_s3, %s415_s30 }
 0x106   : > { %v272_v24 = vadd.f32 %v271_v22, %v270_v20  ;;  %s313_s6 = sshll.u32 %s172_s5, 4  ;;  %s287_s9 = scalar_lea.sflag [#allocation5], %s704_s27  ;;  %s747_s6 = int_to_ptr.vmem [resolvable:$true] %s313_s6 }
 0x107   : > { %v266_v25 = vadd.f32 %v265_v23, %v264_v21  ;;  %s533_s16 = scalar_lea.vmem %s747_s6, 32  ;;  %s605_s10 = smov [#allocation4]  }
 0x108   : > { %v273_v26 = vrot.slane %v272_v24, 2  ;;  %p534_p1 = scmp.ne.s32.totalorder %s747_s6, %s533_s16  ;;  %s537_s11 = sshll.u32 %s605_s10, 4  ;;  %s538_s11 = int_to_ptr.vmem [resolvable:$false] %s537_s11 }
 0x109   : > { %v267_v27 = vrot.slane %v266_v25, 1  ;;  %s539_s17 = scalar_lea.vmem %s538_s11, 64  ;;  %p540_p4 = scmp.lt.s32.totalorder %s747_s6, %s538_s11 }
 0x10a   : > { %v274_v28 = vadd.f32 %v273_v26, %v272_v24  ;;  %p535_p2 = pnand %p534_p1, %p664_p5  ;;  %p541_p7 = scmp.lt.s32.totalorder %s539_s17, %s533_s16 }
 0x10b   : > { %v268_v30 = vadd.f32 %v267_v27, %v266_v25 }
 0x10c   : > { %v275_v29 = vrot.slane %v274_v28, 1  ;;  %p536_p3 = pneg %p535_p2  ;;  %p542_p8 = por %p541_p7, %p540_p4 }
 0x10e   : > { %v276_v31 = vadd.f32 %v275_v29, %v274_v28  ;;  %p543_p9 = pnand %p542_p8, %p536_p3 }
 0x110   : > { %v278_v32 = vsel %vm277_vm3, %v268_v30, %v276_v31 }
 0x111   : > { %280 = vst.msk [vmem:[%s172_s5] sm:$0x3] %vm279_vm4, %v278_v32 }
 0x112   : > { %546 = shalt.err (!%p543_p9)
}
 0x113   : > { %s547_s27 = scalar_lea.hbm %s745_s8, 32  ;;  %s551_s24 = scalar_lea.hbm %s791_s3, 128 }
 0x114   : > { %p548_p10 = scmp.ne.s32.totalorder %s745_s8, %s547_s27  ;;  %p552_p13 = scmp.lt.u32.totalorder %s745_s8, %s791_s3 }
 0x115   : > { %p553_p0 = scmp.lt.u32.totalorder %s551_s24, %s547_s27  ;;  %p555_p2 = scmp.lt.u32.totalorder %s547_s27, %s745_s8 }
 0x116   : > { %p549_p11 = pnand %p548_p10, %p664_p5 }
 0x117   : > { %p554_p1 = por %p553_p0, %p552_p13 }
 0x118   : > { %p550_p12 = pneg %p549_p11 }
 0x119   : > { %p556_p3 = por %p555_p2, %p554_p1 }
 0x11b   : > { %p557_p4 = pnand %p556_p3, %p550_p12 }
 0x11d   : > { %560 = shalt.err (!%p557_p4)
}
 0x11e   : > { %459 = dma.vmem_to_hbm [thread:$0]  (%p664_p5), %s747_s6, 32, %s745_s8, %s287_s9  }
 0x11f PF: > { %p469_p7 = scmp.ge.s32.totalorder %s599_s15, 2  ;;  %s325_s28 = sand.u32 1, %s587_s12  }
 0x120   : > { %s326_s29 = scalar_lea.sflag [#allocation3], %s325_s28 }
 0x121   : > { %p463_p8 = pnand %p469_p7, %p668_p6 }
 0x123   : > { %578 = dma.done.wait (!%p463_p8), %s326_s29, 128  }
 0x124   : > { %580 = vsyncadd (!%p463_p8), %s326_s29, 4294967168  ;;  %s335_s30 = scalar_lea.sflag [#allocation5], %s325_s28 }
 0x125   : > { %582 = dma.done.wait (!%p463_p8), %s335_s30, 32  }
 0x126   : > { %584 = vsyncadd (!%p463_p8), %s335_s30, 4294967264  ;;  %p17_p5 = scmp.ge.s32.totalorder %s651_s18, 6   ;;  %s794_s12 = smov %s591_s13 }
 0x127   : > { %s795_s13 = smov %s595_s14  ;;  %s796_s14 = smov %s662_s21 }
 0x128   : > { %s797_s15 = smov %s651_s18  ;;  %19 = sbr.rel (!%p17_p5) target bundleno = 5 (0x5), region = 80 }
 0x12f   :  { %340 = vsyncpa [#allocation3], 1 }
 0x130   :  { %342 = vsyncpa [#allocation3 + $0x1], 1 }
 0x131   :  { %343 = vsyncpa [#allocation5], 1 }
 0x132   :  { %345 = vsyncpa [#allocation5 + $0x1], 1 }

</bundles_post_ra>
